<compile_context>
chip_gen: v6e
topology: v6e:2x2x1
jax: 0.10.0
libtpu: 0.0.40
codegen_flags: <defaults>
</compile_context>

<pallas_src>
import jax
import jax.numpy as jnp
import numpy as np
from jax.experimental import pallas as pl
from jax.experimental.pallas import tpu as pltpu

INPUT_SIZE = 16
HIDDEN_SIZE = 32
OUTPUT_SIZE = 10
NUM_LAYERS = 2
BATCH = 1                          # nn.LSTM hidden from initHidden() has batch=1
GATES = 4 * HIDDEN_SIZE            # 128 lanes -> exactly one vreg wide

assert INPUT_SIZE <= HIDDEN_SIZE, "layer-0 weight block assumes I <= H"
assert 2 * NUM_LAYERS * HIDDEN_SIZE == GATES, "packed state row assumes 2*L*H == 128"

# ---- weight-slab row layout (static) ----------------------------------------
W_BLOCK = 2 * HIDDEN_SIZE                  # uniform per-layer block: [W_ih ; W_hh] (zero-padded)
WOUT_OFF = NUM_LAYERS * W_BLOCK            # (H, 128) zero-padded Linear weight
B_OFF = WOUT_OFF + HIDDEN_SIZE             # NUM_LAYERS rows of combined (b_ih + b_hh)
BOUT_OFF = B_OFF + NUM_LAYERS              # 1 row: zero-padded Linear bias
SLAB_ROWS = ((BOUT_OFF + 1 + 7) // 8) * 8  # pad sublanes to a multiple of 8

# ---- state-slab row layout (x + h + c packed into one (8,128) slab) ---------
# row 0            : x at lanes [0:I]
# row 1            : h_0 at lanes [I:I+H]   (pre-positioned for the layer-0 LHS)
# rows 2..L        : h_l (l>=1) at lanes [0:H]
# rows L+1..2L     : c_l at lanes [0:H]
STATE_ROWS = 8


def rnn_lstm_kernel(slab_ref, w_ref, out_ref):
    """slab:(8,128) packed x/h/c   w:(SLAB_ROWS,128) packed weights   out:(8,128)."""
    H = HIDDEN_SIZE
    K = 2 * H

    # Layer-0 LHS [x | h_0]: rows are pre-positioned at disjoint lanes -> VALU add.
    z = (slab_ref[0:1, :] + slab_ref[1:2, :])[:, :K]          # (1, 2H)

    h_outs, c_outs = [], []
    for l in range(NUM_LAYERS):                               # static unroll (serial dep)
        w = w_ref[l * W_BLOCK:(l + 1) * W_BLOCK, :]           # (2H, 128)
        b = w_ref[B_OFF + l:B_OFF + l + 1, :]                 # (1, 128)
        c = slab_ref[1 + NUM_LAYERS + l:2 + NUM_LAYERS + l, :H]  # (1, H)

        # One fused MXU push per layer: [x|h] @ [W_ih ; W_hh] + (b_ih+b_hh).
        gates = jnp.dot(z, w, preferred_element_type=jnp.float32) + b   # (1, 128)

        # Two full-vreg transcendental pushes, then lane-slice (gate order i,f,g,o).
        sig = jax.nn.sigmoid(gates)
        th = jnp.tanh(gates)
        i_g = sig[:, 0:H]
        f_g = sig[:, H:2 * H]
        g_g = th[:, 2 * H:3 * H]
        o_g = sig[:, 3 * H:4 * H]

        c_new = f_g * c + i_g * g_g
        h_new = o_g * jnp.tanh(c_new)
        h_outs.append(h_new)
        c_outs.append(c_new)

        if l + 1 < NUM_LAYERS:
            h_next = slab_ref[2 + l:3 + l, :H]                # h_{l+1} at lanes 0:H
            z = jnp.concatenate([h_new, h_next], axis=1)      # (1, 2H)

    # ---- out1: Linear(H, OUT) on a lane-padded (H, 128) weight ---------------
    wout = w_ref[WOUT_OFF:WOUT_OFF + H, :]                    # cols >= OUTPUT_SIZE are 0
    bout = w_ref[BOUT_OFF:BOUT_OFF + 1, :]
    logits = jnp.dot(h_outs[-1], wout, preferred_element_type=jnp.float32) + bout  # (1,128)

    # ---- LogSoftmax(dim=1) with padded lanes masked out -----------------------
    lane = jax.lax.broadcasted_iota(jnp.int32, logits.shape, 1)
    valid = lane < OUTPUT_SIZE
    masked = jnp.where(valid, logits, jnp.float32(-1e30))
    m = jnp.max(masked, axis=-1, keepdims=True)
    e = jnp.where(valid, jnp.exp(logits - m), jnp.float32(0.0))
    lse = jnp.log(jnp.sum(e, axis=-1, keepdims=True))
    logp = jnp.where(valid, logits - m - lse, jnp.float32(0.0))   # clean padded lanes

    # ---- single lane-dense (8,128) output slab: one full store, one DMA out ---
    state_row = jnp.concatenate(h_outs + c_outs, axis=1)          # (1, 2*L*H) = (1,128)
    pad = jnp.zeros((STATE_ROWS - 2, GATES), jnp.float32)
    out_ref[...] = jnp.concatenate([logp, state_row, pad], axis=0)


def pack_params(params):
    """Pack all weights/biases into one (SLAB_ROWS, 128) f32 slab (one DMA)."""
    wih0, whh0, b0, wihr, whhr, br, wout, bout = params
    H = HIDDEN_SIZE
    rows = []
    blk0 = jnp.zeros((W_BLOCK, GATES), jnp.float32)
    blk0 = blk0.at[:INPUT_SIZE, :].set(wih0)
    blk0 = blk0.at[INPUT_SIZE:INPUT_SIZE + H, :].set(whh0)
    rows.append(blk0)                                               # layer 0 (2H, 128)
    for l in range(1, NUM_LAYERS):
        rows.append(jnp.concatenate([wihr[l - 1], whhr[l - 1]], axis=0))  # (2H, 128)
    wout_pad = jnp.zeros((H, GATES), jnp.float32).at[:, :OUTPUT_SIZE].set(wout)
    rows.append(wout_pad)
    rows.append(b0)                                                 # combined biases
    for l in range(1, NUM_LAYERS):
        rows.append(br[l - 1])
    bout_pad = jnp.zeros((1, GATES), jnp.float32).at[:, :OUTPUT_SIZE].set(bout)
    rows.append(bout_pad)
    slab = jnp.concatenate(rows, axis=0)
    pad = SLAB_ROWS - slab.shape[0]
    if pad:
        slab = jnp.concatenate([slab, jnp.zeros((pad, GATES), jnp.float32)], axis=0)
    return slab


def pack_state(x, h0, c0):
    """Pack x, h_0..h_{L-1}, c_0..c_{L-1} into one (8,128) f32 slab (one DMA)."""
    H = HIDDEN_SIZE
    I = INPUT_SIZE
    rows = [jnp.zeros((1, GATES), jnp.float32).at[:, :I].set(x),
            jnp.zeros((1, GATES), jnp.float32).at[:, I:I + H].set(h0[0].reshape(1, H))]
    for l in range(1, NUM_LAYERS):
        rows.append(jnp.zeros((1, GATES), jnp.float32).at[:, :H].set(h0[l].reshape(1, H)))
    for l in range(NUM_LAYERS):
        rows.append(jnp.zeros((1, GATES), jnp.float32).at[:, :H].set(c0[l].reshape(1, H)))
    slab = jnp.concatenate(rows, axis=0)
    pad = STATE_ROWS - slab.shape[0]
    if pad:
        slab = jnp.concatenate([slab, jnp.zeros((pad, GATES), jnp.float32)], axis=0)
    return slab


@jax.jit
def rnn_lstm_forward(x, h0, c0, wslab):
    """x:(1,I)  h0,c0:(L,1,H)  wslab: packed weight slab. Returns (logp, hn, cn)."""
    slab = pack_state(x, h0, c0)                                    # (8, 128)
    vmem = pl.BlockSpec(memory_space=pltpu.MemorySpace.VMEM)
    out = pl.pallas_call(
        rnn_lstm_kernel,
        out_shape=jax.ShapeDtypeStruct((STATE_ROWS, GATES), jnp.float32),
        in_specs=[vmem, vmem],
        out_specs=vmem,
        # In-place update of the state slab's HBM buffer (input fully read into
        # VMEM before the output DMA -> aliasing is hazard-free).
        input_output_aliases={0: 0},
    )(slab, wslab)
    logp = out[0, :OUTPUT_SIZE].reshape(BATCH, OUTPUT_SIZE)
    packed = out[1]                                                 # (128,) = [h | c]
    nh = NUM_LAYERS * HIDDEN_SIZE
    hn = packed[:nh].reshape(NUM_LAYERS, BATCH, HIDDEN_SIZE)
    cn = packed[nh:2 * nh].reshape(NUM_LAYERS, BATCH, HIDDEN_SIZE)
    return logp, hn, cn


def reference(x, h0, c0, params):
    """Pure-JAX reference (PyTorch LSTM semantics) for verification."""
    wih0, whh0, b0, wihr, whhr, br, wout, bout = params
    H = HIDDEN_SIZE

    def cell(x, h, c, wih, whh, b):
        gates = x @ wih + h @ whh + b
        i = jax.nn.sigmoid(gates[:, :H])
        f = jax.nn.sigmoid(gates[:, H:2 * H])
        g = jnp.tanh(gates[:, 2 * H:3 * H])
        o = jax.nn.sigmoid(gates[:, 3 * H:])
        c2 = f * c + i * g
        return o * jnp.tanh(c2), c2

    hs, cs = [], []
    h, c = cell(x, h0[0], c0[0], wih0, whh0, b0)
    hs.append(h); cs.append(c)
    for l in range(1, NUM_LAYERS):
        h, c = cell(h, h0[l], c0[l], wihr[l - 1], whhr[l - 1], br[l - 1])
        hs.append(h); cs.append(c)
    logits = h @ wout + bout
    return jax.nn.log_softmax(logits, axis=-1), jnp.stack(hs), jnp.stack(cs)


def init_params(key):
    """Deterministic parameter init (shapes match nn.LSTM / nn.Linear, pre-transposed)."""
    ks = jax.random.split(key, 10)
    scale = 1.0 / np.sqrt(HIDDEN_SIZE)
    u = lambda k, shape: jax.random.uniform(k, shape, jnp.float32, -scale, scale)

    wih0 = u(ks[0], (INPUT_SIZE, 4 * HIDDEN_SIZE))          # weight_ih_l0^T
    whh0 = u(ks[1], (HIDDEN_SIZE, 4 * HIDDEN_SIZE))          # weight_hh_l0^T
    b0 = u(ks[2], (1, 4 * HIDDEN_SIZE)) + u(ks[3], (1, 4 * HIDDEN_SIZE))
    wihr = u(ks[4], (NUM_LAYERS - 1, HIDDEN_SIZE, 4 * HIDDEN_SIZE))
    whhr = u(ks[5], (NUM_LAYERS - 1, HIDDEN_SIZE, 4 * HIDDEN_SIZE))
    br = (u(ks[6], (NUM_LAYERS - 1, 1, 4 * HIDDEN_SIZE))
          + u(ks[7], (NUM_LAYERS - 1, 1, 4 * HIDDEN_SIZE)))
    wout = u(ks[8], (HIDDEN_SIZE, OUTPUT_SIZE))              # out1.weight^T
    bout = u(ks[9], (1, OUTPUT_SIZE))
    return (wih0, whh0, b0, wihr, whhr, br, wout, bout)


if __name__ == "__main__":
    key = jax.random.PRNGKey(0)
    k_in, k_h, k_c, k_p = jax.random.split(key, 4)

    # seq_len = 1 (implied by output.squeeze(0) in the PyTorch forward)
    x = jax.random.normal(k_in, (BATCH, INPUT_SIZE), jnp.float32)
    h0 = jax.random.normal(k_h, (NUM_LAYERS, BATCH, HIDDEN_SIZE), jnp.float32)
    c0 = jax.random.normal(k_c, (NUM_LAYERS, BATCH, HIDDEN_SIZE), jnp.float32)
    params = init_params(k_p)
    wslab = pack_params(params)          # one-time weight packing (wrapper side)

    out, hn, cn = rnn_lstm_forward(x, h0, c0, wslab)
    out = jax.block_until_ready(out)
    hn = jax.block_until_ready(hn)
    cn = jax.block_until_ready(cn)

    ref_out, ref_hn, ref_cn = reference(x, h0, c0, params)
    assert np.allclose(np.asarray(out), np.asarray(ref_out), rtol=1e-5, atol=1e-5)
    assert np.allclose(np.asarray(hn), np.asarray(ref_hn), rtol=1e-5, atol=1e-5)
    assert np.allclose(np.asarray(cn), np.asarray(ref_cn), rtol=1e-5, atol=1e-5)

    print("KERNEL_OK")
</pallas_src>

<mosaic_0001>
module attributes {stable_mosaic.version = 11 : i64} {
  func.func @rnn_lstm_kernel(%arg0: memref<8x128xf32, #tpu.memory_space<vmem>>, %arg1: memref<168x128xf32, #tpu.memory_space<vmem>>, %arg2: memref<8x128xf32, #tpu.memory_space<vmem>>) attributes {dimension_semantics = [], scalar_prefetch = 0 : i64, scratch_operands = 0 : i64, tpu.core_type = #tpu.core_type<tc>} {
    %c0 = arith.constant 0 : index
    %c0_0 = arith.constant 0 : index
    %0 = vector.load %arg0[%c0, %c0_0] : memref<8x128xf32, #tpu.memory_space<vmem>>, vector<1x128xf32>
    %c1 = arith.constant 1 : index
    %c0_1 = arith.constant 0 : index
    %1 = vector.load %arg0[%c1, %c0_1] : memref<8x128xf32, #tpu.memory_space<vmem>>, vector<1x128xf32>
    %2 = arith.addf %0, %1 : vector<1x128xf32>
    %3 = vector.extract_strided_slice %2 {offsets = [0, 0], sizes = [1, 64], strides = [1, 1]} : vector<1x128xf32> to vector<1x64xf32>
    %c0_2 = arith.constant 0 : index
    %c0_3 = arith.constant 0 : index
    %4 = vector.load %arg1[%c0_2, %c0_3] : memref<168x128xf32, #tpu.memory_space<vmem>>, vector<64x128xf32>
    %c160 = arith.constant 160 : index
    %c0_4 = arith.constant 0 : index
    %5 = vector.load %arg1[%c160, %c0_4] : memref<168x128xf32, #tpu.memory_space<vmem>>, vector<1x128xf32>
    %c3 = arith.constant 3 : index
    %c0_5 = arith.constant 0 : index
    %6 = vector.load %arg0[%c3, %c0_5] : memref<8x128xf32, #tpu.memory_space<vmem>>, vector<1x32xf32>
    %cst = arith.constant dense<0.000000e+00> : vector<1x128xf32>
    %7 = tpu.matmul %3, %4, %cst {dimension_numbers = #tpu.dot_dimension_numbers<[1], [0], [0], [1], [0, 0, 1, 1], [], []>} : vector<1x64xf32>, vector<64x128xf32>, vector<1x128xf32> -> vector<1x128xf32>
    %8 = arith.addf %7, %5 : vector<1x128xf32>
    %9 = arith.negf %8 : vector<1x128xf32>
    %10 = math.exp %9 : vector<1x128xf32>
    %cst_6 = arith.constant 1.000000e+00 : f32
    %11 = vector.broadcast %cst_6 : f32 to vector<1x128xf32>
    %12 = arith.addf %11, %10 : vector<1x128xf32>
    %13 = arith.divf %11, %12 : vector<1x128xf32>
    %14 = math.tanh %8 : vector<1x128xf32>
    %15 = vector.extract_strided_slice %13 {offsets = [0, 0], sizes = [1, 32], strides = [1, 1]} : vector<1x128xf32> to vector<1x32xf32>
    %16 = vector.extract_strided_slice %13 {offsets = [0, 32], sizes = [1, 32], strides = [1, 1]} : vector<1x128xf32> to vector<1x32xf32>
    %17 = vector.extract_strided_slice %14 {offsets = [0, 64], sizes = [1, 32], strides = [1, 1]} : vector<1x128xf32> to vector<1x32xf32>
    %18 = vector.extract_strided_slice %13 {offsets = [0, 96], sizes = [1, 32], strides = [1, 1]} : vector<1x128xf32> to vector<1x32xf32>
    %19 = arith.mulf %16, %6 : vector<1x32xf32>
    %20 = arith.mulf %15, %17 : vector<1x32xf32>
    %21 = arith.addf %19, %20 : vector<1x32xf32>
    %22 = math.tanh %21 : vector<1x32xf32>
    %23 = arith.mulf %18, %22 : vector<1x32xf32>
    %c2 = arith.constant 2 : index
    %c0_7 = arith.constant 0 : index
    %24 = vector.load %arg0[%c2, %c0_7] : memref<8x128xf32, #tpu.memory_space<vmem>>, vector<1x32xf32>
    %25 = tpu.concatenate %23, %24 in 1 : vector<1x32xf32>, vector<1x32xf32> -> vector<1x64xf32>
    %c64 = arith.constant 64 : index
    %c0_8 = arith.constant 0 : index
    %26 = vector.load %arg1[%c64, %c0_8] : memref<168x128xf32, #tpu.memory_space<vmem>>, vector<64x128xf32>
    %c161 = arith.constant 161 : index
    %c0_9 = arith.constant 0 : index
    %27 = vector.load %arg1[%c161, %c0_9] : memref<168x128xf32, #tpu.memory_space<vmem>>, vector<1x128xf32>
    %c4 = arith.constant 4 : index
    %c0_10 = arith.constant 0 : index
    %28 = vector.load %arg0[%c4, %c0_10] : memref<8x128xf32, #tpu.memory_space<vmem>>, vector<1x32xf32>
    %cst_11 = arith.constant dense<0.000000e+00> : vector<1x128xf32>
    %29 = tpu.matmul %25, %26, %cst_11 {dimension_numbers = #tpu.dot_dimension_numbers<[1], [0], [0], [1], [0, 0, 1, 1], [], []>} : vector<1x64xf32>, vector<64x128xf32>, vector<1x128xf32> -> vector<1x128xf32>
    %30 = arith.addf %29, %27 : vector<1x128xf32>
    %31 = arith.negf %30 : vector<1x128xf32>
    %32 = math.exp %31 : vector<1x128xf32>
    %cst_12 = arith.constant 1.000000e+00 : f32
    %33 = vector.broadcast %cst_12 : f32 to vector<1x128xf32>
    %34 = arith.addf %33, %32 : vector<1x128xf32>
    %35 = arith.divf %33, %34 : vector<1x128xf32>
    %36 = math.tanh %30 : vector<1x128xf32>
    %37 = vector.extract_strided_slice %35 {offsets = [0, 0], sizes = [1, 32], strides = [1, 1]} : vector<1x128xf32> to vector<1x32xf32>
    %38 = vector.extract_strided_slice %35 {offsets = [0, 32], sizes = [1, 32], strides = [1, 1]} : vector<1x128xf32> to vector<1x32xf32>
    %39 = vector.extract_strided_slice %36 {offsets = [0, 64], sizes = [1, 32], strides = [1, 1]} : vector<1x128xf32> to vector<1x32xf32>
    %40 = vector.extract_strided_slice %35 {offsets = [0, 96], sizes = [1, 32], strides = [1, 1]} : vector<1x128xf32> to vector<1x32xf32>
    %41 = arith.mulf %38, %28 : vector<1x32xf32>
    %42 = arith.mulf %37, %39 : vector<1x32xf32>
    %43 = arith.addf %41, %42 : vector<1x32xf32>
    %44 = math.tanh %43 : vector<1x32xf32>
    %45 = arith.mulf %40, %44 : vector<1x32xf32>
    %c128 = arith.constant 128 : index
    %c0_13 = arith.constant 0 : index
    %46 = vector.load %arg1[%c128, %c0_13] : memref<168x128xf32, #tpu.memory_space<vmem>>, vector<32x128xf32>
    %c162 = arith.constant 162 : index
    %c0_14 = arith.constant 0 : index
    %47 = vector.load %arg1[%c162, %c0_14] : memref<168x128xf32, #tpu.memory_space<vmem>>, vector<1x128xf32>
    %cst_15 = arith.constant dense<0.000000e+00> : vector<1x128xf32>
    %48 = tpu.matmul %45, %46, %cst_15 {dimension_numbers = #tpu.dot_dimension_numbers<[1], [0], [0], [1], [0, 0, 1, 1], [], []>} : vector<1x32xf32>, vector<32x128xf32>, vector<1x128xf32> -> vector<1x128xf32>
    %49 = arith.addf %48, %47 : vector<1x128xf32>
    %50 = tpu.iota {dimensions = array<i32: 1>} : vector<1x128xi32>
    %c10_i32 = arith.constant 10 : i32
    %51 = vector.broadcast %c10_i32 : i32 to vector<1x128xi32>
    %52 = arith.cmpi slt, %50, %51 : vector<1x128xi32>
    %cst_16 = arith.constant -1.000000e+30 : f32
    %53 = vector.broadcast %cst_16 : f32 to vector<1x128xf32>
    %54 = arith.select %52, %49, %53 : vector<1x128xi1>, vector<1x128xf32>
    %cst_17 = arith.constant dense<0xFF800000> : vector<1xf32>
    %55 = vector.multi_reduction <maximumf>, %54, %cst_17 [1] : vector<1x128xf32> to vector<1xf32>
    %56 = vector.shape_cast %55 : vector<1xf32> to vector<1x1xf32>
    %57 = vector.broadcast %56 : vector<1x1xf32> to vector<1x128xf32>
    %58 = arith.subf %49, %57 : vector<1x128xf32>
    %59 = math.exp %58 : vector<1x128xf32>
    %cst_18 = arith.constant 0.000000e+00 : f32
    %60 = vector.broadcast %cst_18 : f32 to vector<1x128xf32>
    %61 = arith.select %52, %59, %60 : vector<1x128xi1>, vector<1x128xf32>
    %cst_19 = arith.constant dense<0.000000e+00> : vector<1xf32>
    %62 = vector.multi_reduction <add>, %61, %cst_19 [1] : vector<1x128xf32> to vector<1xf32>
    %63 = vector.shape_cast %62 : vector<1xf32> to vector<1x1xf32>
    %64 = math.log %63 : vector<1x1xf32>
    %65 = vector.broadcast %56 : vector<1x1xf32> to vector<1x128xf32>
    %66 = arith.subf %49, %65 : vector<1x128xf32>
    %67 = vector.broadcast %64 : vector<1x1xf32> to vector<1x128xf32>
    %68 = arith.subf %66, %67 : vector<1x128xf32>
    %cst_20 = arith.constant 0.000000e+00 : f32
    %69 = vector.broadcast %cst_20 : f32 to vector<1x128xf32>
    %70 = arith.select %52, %68, %69 : vector<1x128xi1>, vector<1x128xf32>
    %71 = tpu.concatenate %23, %45, %21, %43 in 1 : vector<1x32xf32>, vector<1x32xf32>, vector<1x32xf32>, vector<1x32xf32> -> vector<1x128xf32>
    %cst_21 = arith.constant 0.000000e+00 : f32
    %72 = vector.broadcast %cst_21 : f32 to vector<6x128xf32>
    %73 = tpu.concatenate %70, %71, %72 in 0 : vector<1x128xf32>, vector<1x128xf32>, vector<6x128xf32> -> vector<8x128xf32>
    %c0_22 = arith.constant 0 : index
    %c0_23 = arith.constant 0 : index
    %74 = vector.load %arg2[%c0_22, %c0_23] : memref<8x128xf32, #tpu.memory_space<vmem>>, vector<8x128xf32>
    tpu.vector_store %arg2[%c0_22, %c0_23], %73 {strides = array<i32>} : memref<8x128xf32, #tpu.memory_space<vmem>>, vector<8x128xf32>,
    return
  }
}

</mosaic_0001>

<bundles_post_ra>
// kernel: rnn_lstm_forward.1
= control target key start
LH: loop header
LB: loop body
LE: loop exit
PB: predicated region body
PF: predicated region fallthrough
CT: control target
= control target key end

     0   :  { %7 = vsyncpa [#allocation3], 0  ;;  %s514_s9 = smov [#allocation2]   ;;  %s617_s0 = inlined_call_operand.vmem [shape: f32[8,128], index: 0, kind: input, shape index: {}, may-alias: {0,2}]   ;;  %s618_s1 = inlined_call_operand.hbm [shape: f32[168,128], index: 1, kind: input, shape index: {}]   ;;  %s619_s2 = inlined_call_operand.vmem [shape: f32[8,128], index: 2, kind: output, shape index: {}, may-alias: {0,2}]  }
   0x1   :  { %s15_s10 = sshll.u32 %s514_s9, 4  ;;  %s16_s10 = int_to_ptr.vmem [resolvable:$true] %s15_s10 }
   0x2   :  { %s500_s11 = scalar_lea.vmem %s16_s10, 2688  ;;  %p505_p1 = scmp.lt.s32.totalorder %s16_s10, %s16_s10 }
   0x3   :  { %p501_p0 = scmp.ne.s32.totalorder %s16_s10, %s500_s11  ;;  %p506_p2 = scmp.lt.s32.totalorder %s500_s11, %s500_s11 }
   0x5   :  { %p507_p3 = por %p506_p2, %p505_p1 }
   0x7   :  { %p508_p4 = pnand %p507_p3, %p501_p0 }
   0x9   :  { %511 = shalt.err (!%p508_p4)
}
   0xa   :  { %s515_s12 = smov 128   ;;  %s516_s13 = smov 8  }
   0xb   :  { %21 = dma.hbm_to_vmem [thread:$0]  %s618_s1, 2688, %s16_s10, [#allocation3], %s515_s12, %s515_s12, %s516_s13  }
   0xc   :  { %512 = dma.done.wait [#allocation3], 2688  }
   0xd   :  { %513 = vsyncadd [#allocation3], 4294964608  ;;  %v517_v0 = vmov 0.0   ;;  %vm518_vm0 = vmmov 0   ;;  %v35_v1 = vld [vmem:[#allocation2 + $0x38] sm:$0xff]  ;;  %v34_v2 = vld [vmem:[#allocation2 + $0x30] sm:$0xff] }
   0xe   :  { %416 = vmatprep.subr.mxu0 %v517_v0  ;;  %432 = vmatprep.mubr.msk.f32.mxu0 %vm518_vm0, %v517_v0  ;;  %v33_v3 = vld [vmem:[#allocation2 + $0x28] sm:$0xff]  ;;  %v32_v4 = vld [vmem:[#allocation2 + $0x20] sm:$0xff]  ;;  %v31_v5 = vld [vmem:[#allocation2 + $0x18] sm:$0xff]  ;;  %vm38_vm1 = vcmask 523264   ;;  %s519_s19 = smov 64   ;;  %s520_s22 = smov 32  }
   0xf   :  { %435 = vmatprep.subr.mxu1 %v517_v0  ;;  %451 = vmatprep.mubr.msk.f32.mxu1 %vm518_vm0, %v517_v0  ;;  %v30_v6 = vld [vmem:[#allocation2 + $0x10] sm:$0xff]  ;;  %v25_v7 = vld [vmem:[%s617_s0] sm:$0x1]  ;;  %v26_v8 = vld [vmem:[%s617_s0 + $0x1] sm:$0x1]  ;;  %vm149_vm2 = vcmask 261120  }
  0x10   :  { %417 = vmatpush3.msra.mxu0 %v35_v1  ;;  %v29_v9 = vld [vmem:[#allocation2 + $0x8] sm:$0xff]  ;;  %v28_v10 = vld [vmem:[#allocation2] sm:$0xff]  ;;  %v27_v11 = vadd.f32 %v26_v8, %v25_v7  ;;  %v158_v28 = vld [vmem:[#allocation2 + $0x78] sm:$0xff]  ;;  %vm346_vm4 = vcmask 1040384   ;;  %vm374_vm5 = vcmask 785408   ;;  %vm380_vm6 = vcmask 1041408  }
  0x11   :  { %418 = vmatprep.subr.mxu0 %v517_v0  ;;  %v36_v12 = vld [vmem:[#allocation2 + $0xa0] sm:$0x1]  ;;  %v37_v17 = vld [vmem:[%s617_s0 + $0x3] sm:$0x1]  ;;  %v157_v29 = vld [vmem:[#allocation2 + $0x70] sm:$0xff]  ;;  %436 = vmatpush3.msra.mxu1 %v158_v28 }
  0x12   :  { %419 = vmatpush3.msra.mxu0 %v34_v2  ;;  %437 = vmatprep.subr.mxu1 %v517_v0  ;;  %v156_v30 = vld [vmem:[#allocation2 + $0x68] sm:$0xff]  ;;  %v155_v31 = vld [vmem:[#allocation2 + $0x60] sm:$0xff]  ;;  %v154_v32 = vld [vmem:[#allocation2 + $0x58] sm:$0xff] }
  0x13   :  { %420 = vmatprep.subr.mxu0 %v517_v0  ;;  %438 = vmatpush3.msra.mxu1 %v157_v29  ;;  %v153_v33 = vld [vmem:[#allocation2 + $0x50] sm:$0xff]  ;;  %v152_v35 = vld [vmem:[#allocation2 + $0x48] sm:$0xff]  ;;  %v140_v36 = vld [vmem:[%s617_s0 + $0x2] sm:$0x1] }
  0x14   :  { %421 = vmatpush3.msra.mxu0 %v33_v3  ;;  %439 = vmatprep.subr.mxu1 %v517_v0  ;;  %v151_v37 = vld [vmem:[#allocation2 + $0x40] sm:$0xff]  ;;  %v265_v59 = vld [vmem:[#allocation2 + $0x98] sm:$0xff]  ;;  %v264_v60 = vld [vmem:[#allocation2 + $0x90] sm:$0xff] }
  0x15   :  { %422 = vmatprep.subr.mxu0 %v517_v0  ;;  %440 = vmatpush3.msra.mxu1 %v156_v30  ;;  %v160_v38 = vld [vmem:[%s617_s0 + $0x4] sm:$0x1]  ;;  %v159_v44 = vld [vmem:[#allocation2 + $0xa1] sm:$0x1]  ;;  %v263_v61 = vld [vmem:[#allocation2 + $0x88] sm:$0xff] }
  0x16   :  { %423 = vmatpush3.msra.mxu0 %v32_v4  ;;  %441 = vmatprep.subr.mxu1 %v517_v0  ;;  %v262_v62 = vld [vmem:[#allocation2 + $0x80] sm:$0xff]  ;;  %v342_v4 = vlaneseq }
  0x17   :  { %424 = vmatprep.subr.mxu0 %v517_v0  ;;  %442 = vmatpush3.msra.mxu1 %v155_v31 }
  0x18   :  { %425 = vmatpush3.msra.mxu0 %v31_v5  ;;  %443 = vmatprep.subr.mxu1 %v517_v0  ;;  %v343_v5 = vand.u32 127, %v342_v4 }
  0x19   :  { %426 = vmatprep.subr.mxu0 %v517_v0  ;;  %444 = vmatpush3.msra.mxu1 %v154_v32 }
  0x1a   :  { %427 = vmatpush3.msra.mxu0 %v30_v6  ;;  %445 = vmatprep.subr.mxu1 %v517_v0  ;;  %v266_v6 = vld [vmem:[#allocation2 + $0xa2] sm:$0x1]  ;;  %vm344_vm3 = vcmp.lt.s32.totalorder %v343_v5, 10 }
  0x1b   :  { %428 = vmatprep.subr.mxu0 %v517_v0  ;;  %446 = vmatpush3.msra.mxu1 %v153_v33 }
  0x1c   :  { %429 = vmatpush3.msra.mxu0 %v29_v9  ;;  %447 = vmatprep.subr.mxu1 %v517_v0 }
  0x1d   :  { %430 = vmatprep.subr.mxu0 %v517_v0  ;;  %448 = vmatpush3.msra.mxu1 %v152_v35 }
  0x1e   :  { %431 = vmatpush3.msra.mxu0 %v28_v10  ;;  %449 = vmatprep.subr.mxu1 %v517_v0 }
  0x1f   :  { %433 = vmatmul.mubr.msk.f32.vlgmr.msra.gmra.mxu0 %vm38_vm1, %v27_v11  ;;  %454 = vmatprep.subr.mxu0 %v517_v0 }
  0x20   :  { %462 = vmatprep.mubr.msk.f32.mxu0 %vm518_vm0, %v517_v0  ;;  %450 = vmatpush3.msra.mxu1 %v151_v37 }
  0x21   :  { %455 = vmatpush3.msra.mxu0 %v265_v59 }
  0x22   :  { %456 = vmatprep.subr.mxu0 %v517_v0 }
  0x23   :  { %457 = vmatpush3.msra.mxu0 %v264_v60 }
  0x24   :  { %458 = vmatprep.subr.mxu0 %v517_v0 }
  0x25   :  { %459 = vmatpush3.msra.mxu0 %v263_v61 }
  0x26   :  { %460 = vmatprep.subr.mxu0 %v517_v0 }
  0x27   :  { %461 = vmatpush3.msra.mxu0 %v262_v62 }
  0xdf   :  { %v108_v13 = vpop.f32.mrf.mxu0 }
  0xe0   :  { %v109_v14 = vadd.f32 %v108_v13, %v36_v12 }
  0xe1   :  { %v434_v15 = vpop.f32.mrf.mxu0 }
  0xe2   :  { %472 = vtanh.f32 %v109_v14  ;;  %v389_v18 = vmul.f32 -1.442695, %v109_v14 }
  0xe4   :  { %474 = vpow2.f32 %v389_v18 }
  0xef   :  { %v473_v16 = vpop.eup %472 }
  0xf0   :  { %125 = vrot.lane.b32.xlu0 %v473_v16, %s519_s19 }
  0xf1   :  { %v475_v19 = vpop.eup %474 }
  0xf2   :  { %v115_v20 = vadd.f32 1.0, %v475_v19 }
  0xf4   :  { %120 = vrot.lane.b32.xlu0 %v37_v17, %s520_s22  ;;  %476 = vrcp.f32 %v115_v20 }
 0x101   :  { %v477_v21 = vpop.eup %476 }
 0x162   :  { %v126_v22 = vpop.permute.xlu0 %125 }
 0x163   :  { %v128_v23 = vmul.f32 %v477_v21, %v126_v22 }
 0x165   :  { %130 = vrot.lane.b32.xlu1 %v128_v23, %s520_s22 }
 0x166   :  { %v121_v24 = vpop.permute.xlu0 %120 }
 0x167   :  { %v123_v25 = vmul.f32 %v477_v21, %v121_v24 }
 0x1d7   :  { %v131_v26 = vpop.permute.xlu1 %130 }
 0x1d8   :  { %v568_v27 = vadd.f32 %v131_v26, %v123_v25 }
 0x1da   :  { %478 = vtanh.f32 %v568_v27 }
 0x1e7   :  { %v479_v34 = vpop.eup %478 }
 0x1e8   :  { %136 = vrot.lane.b32.xlu1 %v479_v34, %s519_s19 }
 0x1ec   :  { %146 = vrot.lane.b32.xlu1 %v140_v36, %s520_s22 }
 0x1f0   :  { %242 = vrot.lane.b32.xlu1 %v160_v38, %s520_s22 }
 0x25a   :  { %v137_v39 = vpop.permute.xlu1 %136 }
 0x25b   :  { %v139_v40 = vmul.f32 %v477_v21, %v137_v39 }
 0x25d   :  { %142 = vrot.lane.b32.xlu0 %v139_v40, %s520_s22 }
 0x25e   :  { %v147_v41 = vpop.permute.xlu1 %146 }
 0x262   :  { %v243_v55 = vpop.permute.xlu1 %242 }
 0x2cf   :  { %v588_v42 = vpop.permute.xlu0 %142 }
 0x2d0   :  { %v150_v43 = vsel %vm149_vm2, %v588_v42, %v147_v41 }
 0x2d1   :  { %452 = vmatmul.mubr.msk.f32.vlgmr.msra.gmra.mxu1 %vm38_vm1, %v150_v43 }
 0x391   :  { %v230_v45 = vpop.f32.mrf.mxu1 }
 0x392   :  { %v231_v46 = vadd.f32 %v230_v45, %v159_v44 }
 0x393   :  { %v453_v47 = vpop.f32.mrf.mxu1 }
 0x394   :  { %480 = vtanh.f32 %v231_v46  ;;  %v391_v49 = vmul.f32 -1.442695, %v231_v46 }
 0x396   :  { %482 = vpow2.f32 %v391_v49 }
 0x3a1   :  { %v481_v48 = vpop.eup %480 }
 0x3a2   :  { %247 = vrot.lane.b32.xlu0 %v481_v48, %s519_s19 }
 0x3a3   :  { %v483_v50 = vpop.eup %482 }
 0x3a4   :  { %v237_v51 = vadd.f32 1.0, %v483_v50 }
 0x3a6   :  { %484 = vrcp.f32 %v237_v51 }
 0x3b3   :  { %v485_v52 = vpop.eup %484 }
 0x3b4   :  { %v245_v56 = vmul.f32 %v485_v52, %v243_v55 }
 0x414   :  { %v248_v53 = vpop.permute.xlu0 %247 }
 0x415   :  { %v250_v54 = vmul.f32 %v485_v52, %v248_v53 }
 0x417   :  { %252 = vrot.lane.b32.xlu0 %v250_v54, %s520_s22 }
 0x489   :  { %v253_v57 = vpop.permute.xlu0 %252 }
 0x48a   :  { %v255_v58 = vadd.f32 %v253_v57, %v245_v56 }
 0x48c   :  { %486 = vtanh.f32 %v255_v58 }
 0x499   :  { %v487_v63 = vpop.eup %486 }
 0x49a   :  { %258 = vrot.lane.b32.xlu1 %v487_v63, %s519_s19 }
 0x50c   :  { %v259_v1 = vpop.permute.xlu1 %258 }
 0x50d   :  { %v261_v2 = vmul.f32 %v485_v52, %v259_v1 }
 0x50f   :  { %268 = vrot.lane.b32.xlu0 %v261_v2, %s520_s22 }
 0x581   :  { %v269_v3 = vpop.permute.xlu0 %268 }
 0x582   :  { %463 = vmatmul.mubr.msk.f32.vlgmr.msra.gmra.mxu0 %vm149_vm2, %v269_v3 }
 0x642   :  { %v338_v7 = vpop.f32.mrf.mxu0 }
 0x643   :  { %v339_v8 = vadd.f32 %v338_v7, %v266_v6 }
 0x644   :  { %v464_v9 = vpop.f32.mrf.mxu0 }
 0x645   :  { %v345_v0 = vsel %vm344_vm3, %v339_v8, -1e+30 }
 0x646   :  { %v347_v10 = vsel %vm346_vm4, %v345_v0, -inf }
 0x647   :  { %348 = vmax.xlane.f32.xlu1 %v347_v10 }
 0x658   :  { %365 = vrot.lane.b32.xlu1 %v568_v27, %s520_s22 }
 0x65c   :  { %369 = vrot.lane.b32.xlu1 %v255_v58, %s519_s19 }
 0x6d0   :  { %v349_v11 = vpop.xlane.xlu1 %348 }
 0x6d1   :  { %v350_v12 = vsub.f32 %v339_v8, %v349_v11 }
 0x6d3   :  { %v351_v13 = vmul.f32 1.442695, %v350_v12 }
 0x6d4   :  { %v366_v19 = vpop.permute.xlu1 %365 }
 0x6d5   :  { %488 = vpow2.f32 %v351_v13 }
 0x6d8   :  { %v370_v23 = vpop.permute.xlu1 %369 }
 0x6e2   :  { %v489_v14 = vpop.eup %488 }
 0x6e3   :  { %v353_v15 = vsel %vm344_vm3, %v489_v14, 0.0 }
 0x6e4   :  { %v354_v16 = vsel %vm346_vm4, %v353_v15, 0.0 }
 0x6e5   :  { %355 = vadd.xlane.f32.xlu0 %v354_v16 }
 0x6fb   :  { %361 = vrot.lane.b32.xlu0 %v261_v2, %s519_s19 }
 0x76e   :  { %v356_v17 = vpop.xlane.xlu0 %355 }
 0x76f   :  { %490 = vlog2.f32 %v356_v17 }
 0x772   :  { %v362_v18 = vpop.permute.xlu0 %361 }
 0x773   :  { %v372_v20 = vsel %vm149_vm2, %v588_v42, %v362_v18 }
 0x774   :  { %v373_v21 = vsel %vm38_vm1, %v372_v20, %v366_v19 }
 0x775   :  { %v375_v25 = vsel %vm374_vm5, %v373_v21, %v370_v23 }
 0x776   :  { %v377_v27 = vrot.slane %v375_v25, 7 }
 0x77c   :  { %v491_v22 = vpop.eup %490 }
 0x77d   :  { %v358_v24 = vmul.f32 0.6931472, %v491_v22 }
 0x77f   :  { %v359_v26 = vsub.f32 %v350_v12, %v358_v24 }
 0x781   :  { %v360_v28 = vsel %vm344_vm3, %v359_v26, 0.0 }
 0x782   :  { %v379_v29 = vsel %vm346_vm4, %v360_v28, %v377_v27 }
 0x783   :  { %v381_v30 = vsel %vm380_vm6, %v379_v29, 0.0 }
 0x784   :  { %382 = vst [vmem:[%s619_s2] sm:$0xff] %v381_v30 }
 0x785   :  { %387 = vsyncpa [#allocation3], 1 }

</bundles_post_ra>
